<compile_context>
chip_gen: v7x
topology: tpu7x:2x2x1
jax: 0.10.0
libtpu: 0.0.40
codegen_flags: <defaults>
</compile_context>

<pallas_src>
import functools

import jax
import jax.numpy as jnp
from jax.experimental import pallas as pl
from jax.experimental.pallas import tpu as pltpu


# --------------------------------------------------------------------------
# small helpers
# --------------------------------------------------------------------------
def _round_up(a, b):
    return -(-a // b) * b


def _next_pow2(n):
    return 1 << (int(n) - 1).bit_length()


def _tpu_generation():
    """Return (vmem_capacity_bytes, mxu_dim, two_tensorcores) for device 0."""
    kind = ""
    try:
        kind = jax.devices()[0].device_kind.lower()
    except Exception:
        pass
    vmem = None
    try:
        vmem = int(pltpu.get_tpu_info().vmem_capacity_bytes)
    except Exception:
        vmem = None
    if "v7" in kind:
        return (vmem or 64 * 1024 * 1024), 256, True
    if "v6" in kind:
        return (vmem or 128 * 1024 * 1024), 256, False
    # v5e / v5p / unknown: conservative defaults (128 MiB VMEM, 128-wide MXU).
    return (vmem or 128 * 1024 * 1024), 128, False


# --------------------------------------------------------------------------
# kernel
# --------------------------------------------------------------------------
def _mlp_kernel(x_ref, w1s_ref, b1s_ref, w2_ref, b2_ref, w3_ref, b3_ref,
                o_ref, *, dp):
    """One row tile: fused (layer1 | shortcut) matmul, then layer2, layer3."""
    x = x_ref[...]                                              # (tm, dp)

    # Fused first layer + shortcut: one MXU pass with 2*dp output lanes.
    h1s = jnp.dot(x, w1s_ref[...], preferred_element_type=jnp.float32)
    h1s = h1s + b1s_ref[...]                                    # f32 bias
    # dp is a multiple of 128, so the split lands on a vreg lane boundary.
    h = jnp.maximum(h1s[:, :dp], 0.0).astype(w2_ref.dtype)      # ReLU branch
    s = h1s[:, dp:].astype(w2_ref.dtype)                        # shortcut (early cast)

    h = jnp.dot(h, w2_ref[...], preferred_element_type=jnp.float32) + b2_ref[...]
    h = jnp.maximum(h, 0.0).astype(w3_ref.dtype)

    h = jnp.dot(h, w3_ref[...], preferred_element_type=jnp.float32) + b3_ref[...]
    h = jnp.maximum(h, 0.0)

    o_ref[...] = (h + s.astype(jnp.float32)).astype(o_ref.dtype)


# --------------------------------------------------------------------------
# one-time parameter packing (hoisted out of the jitted forward)
# --------------------------------------------------------------------------
def pack_mlp_params(params, input_dim, *, compute_dtype=jnp.bfloat16,
                    dp_target=None):
    """Pad the feature dim to a lane-friendly size, pack `pack` samples per
    128/256-lane row with block-diagonal weights, and fuse layer1 with the
    shortcut into a single (dp, 2*dp) weight.  Call once, reuse per step."""
    D = int(input_dim)
    if dp_target is None:
        _, mxu, _ = _tpu_generation()
        dp_target = mxu                       # 128 on v5e, 256 on v6e/v7x

    if D >= 128:
        d_sub, pack = _round_up(D, 128), 1
    else:
        d_sub = min(_next_pow2(D), 128)       # zero-pad each sample to d_sub
        pack = max(1, dp_target // d_sub)     # samples per packed row
    dp = pack * d_sub                         # multiple of 128 -> lane-dense

    def prep_w(w):
        if d_sub != D:
            w = jnp.pad(w, ((0, d_sub - D), (0, d_sub - D)))
        if pack > 1:
            w = jnp.kron(jnp.eye(pack, dtype=w.dtype), w)       # block-diagonal
        return w.astype(compute_dtype)

    def prep_b(b):
        if d_sub != D:
            b = jnp.pad(b, ((0, 0), (0, d_sub - D)))
        if pack > 1:
            b = jnp.tile(b, (1, pack))
        return b.astype(jnp.float32)

    packed = dict(
        w1s=jnp.concatenate([prep_w(params["w1"]), prep_w(params["ws"])], axis=1),
        b1s=jnp.concatenate([prep_b(params["b1"]), prep_b(params["bs"])], axis=1),
        w2=prep_w(params["w2"]), b2=prep_b(params["b2"]),
        w3=prep_w(params["w3"]), b3=prep_b(params["b3"]),
    )
    meta = dict(input_dim=D, pack=pack, d_sub=d_sub, dp=dp)
    return packed, meta


# --------------------------------------------------------------------------
# forward
# --------------------------------------------------------------------------
@functools.partial(jax.jit, static_argnames=(
    "input_dim", "pack", "d_sub", "tile_m", "out_dtype",
    "single_buffer_weights"))
def mlp_forward_packed(x, packed, *, input_dim, pack, d_sub, tile_m=2048,
                       out_dtype=None, single_buffer_weights=True):
    """x: [N, input_dim].  packed: output of pack_mlp_params."""
    N, D = x.shape
    assert D == input_dim
    dp = pack * d_sub
    compute_dtype = packed["w2"].dtype
    if out_dtype is None:
        out_dtype = compute_dtype              # bf16 out halves the store stream
    cb = jnp.dtype(compute_dtype).itemsize
    ob = jnp.dtype(out_dtype).itemsize

    vmem_cap, _, two_tc = _tpu_generation()
    budget = int(0.75 * vmem_cap)              # generation-aware VMEM budget

    # ---- VMEM accounting (weights single-buffered; f32 intermediates counted)
    weight_bytes = 4 * dp * dp * cb + 4 * dp * 4
    if not single_buffer_weights:
        weight_bytes *= 2
    per_row_bytes = dp * (2 * cb               # x tile, double-buffered
                          + 2 * ob             # out tile, double-buffered
                          + 2 * 4              # h1s: (tm, 2*dp) f32
                          + 2 * 4              # two live (tm, dp) f32 temps
                          + cb)                # shortcut s in compute dtype
    tm_budget = max(8, ((budget - weight_bytes) // per_row_bytes) // 8 * 8)

    # ---- row tiling (packed rows, 8-sublane aligned)
    n_rows = -(-N // pack)
    n_rows8 = _round_up(n_rows, 8)
    tm = max(8, (min(tile_m, tm_budget) // 8) * 8)
    if tm >= n_rows8:
        if two_tc and n_rows8 >= 16:
            tm = _round_up(-(-n_rows8 // 2), 8)   # >=2 steps: feed both v7x TCs
        else:
            tm = n_rows8                          # small input: one aligned block
    rows_p = _round_up(n_rows, tm)
    grid = (rows_p // tm,)

    # ---- pack input into a lane-dense (rows_p, dp) layout
    xp = x.astype(compute_dtype)
    if d_sub != D:
        xp = jnp.pad(xp, ((0, 0), (0, d_sub - D)))
    pad_rows = rows_p * pack - N
    if pad_rows:
        xp = jnp.pad(xp, ((0, pad_rows), (0, 0)))
    xp = xp.reshape(rows_p, dp)

    # ---- cost estimate & VMEM limit
    cost = pl.CostEstimate(
        flops=int(4 * 2 * N * D * D),
        transcendentals=0,
        bytes_accessed=int(N * D * (cb + ob) + 4 * dp * dp * cb),
    )
    vmem_need = weight_bytes + tm * per_row_bytes
    vmem_limit = int(min(max(vmem_need + (4 << 20), 16 << 20), budget))
    # TODO(synk): for very large D (resident weights approaching the budget),
    # tile the K/N axes of each layer with an f32 VMEM accumulator instead of
    # keeping all weights resident (v7x hits this at ~half the D of v5e/v6e).

    # ---- block specs
    row_spec = pl.BlockSpec((tm, dp), lambda i: (i, 0))

    def const_spec(shape):
        index_map = lambda i: (0, 0)
        if single_buffer_weights:
            # Loop-invariant weights/biases: single-buffer to halve their VMEM.
            return pl.BlockSpec(shape, index_map, pipeline_mode=pl.Buffered(1))
        return pl.BlockSpec(shape, index_map)

    out_p = pl.pallas_call(
        functools.partial(_mlp_kernel, dp=dp),
        out_shape=jax.ShapeDtypeStruct((rows_p, dp), out_dtype),
        grid_spec=pltpu.PrefetchScalarGridSpec(
            num_scalar_prefetch=0,
            grid=grid,
            in_specs=[row_spec,
                      const_spec((dp, 2 * dp)), const_spec((1, 2 * dp)),
                      const_spec((dp, dp)), const_spec((1, dp)),
                      const_spec((dp, dp)), const_spec((1, dp))],
            out_specs=row_spec,
        ),
        compiler_params=pltpu.CompilerParams(
            dimension_semantics=("parallel",),
            vmem_limit_bytes=vmem_limit,
        ),
        cost_estimate=cost,
    )(xp, packed["w1s"], packed["b1s"], packed["w2"], packed["b2"],
      packed["w3"], packed["b3"])

    # Unpack: (rows_p, dp) -> (rows_p*pack, d_sub) -> [:N, :D].
    return out_p.reshape(rows_p * pack, d_sub)[:N, :D]


def mlp_forward(x, params, *, compute_dtype=jnp.bfloat16, out_dtype=None,
                tile_m=2048):
    """Convenience wrapper: packs params, then runs the kernel.

    In a real training / inference loop call pack_mlp_params once and reuse
    mlp_forward_packed directly (packing is O(D^2) HBM traffic per call)."""
    packed, meta = pack_mlp_params(params, x.shape[-1],
                                   compute_dtype=compute_dtype)
    kwargs = dict(input_dim=meta["input_dim"], pack=meta["pack"],
                  d_sub=meta["d_sub"], tile_m=tile_m, out_dtype=out_dtype)
    try:
        return mlp_forward_packed(x, packed, single_buffer_weights=True, **kwargs)
    except Exception:
        # Graceful fallback for JAX versions without pipeline_mode=pl.Buffered
        # support in pallas_call: default double-buffered weight specs.
        return mlp_forward_packed(x, packed, single_buffer_weights=False, **kwargs)


# --------------------------------------------------------------------------
# reference & demo
# --------------------------------------------------------------------------
def init_params(key, input_dim):
    """Deterministic init matching nn.Linear shapes (uniform +-1/sqrt(fan_in))."""
    bound = 1.0 / (input_dim ** 0.5)
    keys = jax.random.split(key, 8)

    def lin(kw, kb):
        # PyTorch stores W as [out, in]; kept transposed [in, out] for x @ W.
        w = jax.random.uniform(kw, (input_dim, input_dim), jnp.float32, -bound, bound)
        b = jax.random.uniform(kb, (1, input_dim), jnp.float32, -bound, bound)
        return w, b

    w1, b1 = lin(keys[0], keys[1])
    w2, b2 = lin(keys[2], keys[3])
    w3, b3 = lin(keys[4], keys[5])
    ws, bs = lin(keys[6], keys[7])
    return dict(w1=w1, b1=b1, w2=w2, b2=b2, w3=w3, b3=b3, ws=ws, bs=bs)


def mlp_reference(x, p):
    """Plain-JAX reference (HIGHEST precision so it is a stable baseline)."""
    dot = functools.partial(jnp.dot, precision=jax.lax.Precision.HIGHEST)
    h = jax.nn.relu(dot(x, p["w1"]) + p["b1"])
    h = jax.nn.relu(dot(h, p["w2"]) + p["b2"])
    h = jax.nn.relu(dot(h, p["w3"]) + p["b3"])
    return h + dot(x, p["ws"]) + p["bs"]


if __name__ == "__main__":
    key = jax.random.PRNGKey(0)
    k_x, k_p, k_x2, k_p2 = jax.random.split(key, 4)

    # Case 1: infograph-like demo shape (batch=8, input_dim=32).
    N, D = 8, 32
    x = jax.random.normal(k_x, (N, D), jnp.float32)
    params = init_params(k_p, D)
    ref = mlp_reference(x, params)

    # f32 compute / f32 output (tolerance covers MXU f32 multi-pass rounding).
    out_f32 = jax.block_until_ready(
        mlp_forward(x, params, compute_dtype=jnp.float32, out_dtype=jnp.float32))
    assert out_f32.shape == (N, D)
    assert jnp.allclose(out_f32, ref, atol=5e-3, rtol=5e-3), "f32 mismatch vs reference"

    # bf16 compute / bf16 output (default fast path): looser tolerance.
    out_bf16 = jax.block_until_ready(mlp_forward(x, params))
    assert out_bf16.shape == (N, D)
    assert jnp.allclose(out_bf16.astype(jnp.float32), ref,
                        atol=5e-2, rtol=5e-2), "bf16 mismatch vs reference"

    # Case 2: non-power-of-two feature dim exercises the lane-padding path.
    N2, D2 = 100, 48
    x2 = jax.random.normal(k_x2, (N2, D2), jnp.float32)
    params2 = init_params(k_p2, D2)
    ref2 = mlp_reference(x2, params2)
    out2 = jax.block_until_ready(
        mlp_forward(x2, params2, compute_dtype=jnp.float32, out_dtype=jnp.float32))
    assert out2.shape == (N2, D2)
    assert jnp.allclose(out2, ref2, atol=5e-3, rtol=5e-3), "padded-D mismatch vs reference"

    print("KERNEL_OK")
</pallas_src>

<mosaic_0001>
module attributes {stable_mosaic.version = 11 : i64} {
  func.func @_mlp_kernel(%arg0: i32, %arg1: memref<8x128xf32, #tpu.memory_space<vmem>>, %arg2: memref<128x256xf32, #tpu.memory_space<vmem>>, %arg3: memref<1x256xf32, #tpu.memory_space<vmem>>, %arg4: memref<128x128xf32, #tpu.memory_space<vmem>>, %arg5: memref<1x128xf32, #tpu.memory_space<vmem>>, %arg6: memref<128x128xf32, #tpu.memory_space<vmem>>, %arg7: memref<1x128xf32, #tpu.memory_space<vmem>>, %arg8: memref<8x128xf32, #tpu.memory_space<vmem>>) attributes {dimension_semantics = [#tpu.dimension_semantics<parallel>], iteration_bounds = array<i64: 1>, scalar_prefetch = 0 : i64, scratch_operands = 0 : i64, tpu.core_type = #tpu.core_type<tc>, window_params = [{transform_indices = @transform_0, window_bounds = array<i64: 8, 128>}, {pipeline_mode = #tpu.pipeline_mode<synchronous>, transform_indices = @transform_1, window_bounds = array<i64: 128, 256>}, {pipeline_mode = #tpu.pipeline_mode<synchronous>, transform_indices = @transform_2, window_bounds = array<i64: 1, 256>}, {pipeline_mode = #tpu.pipeline_mode<synchronous>, transform_indices = @transform_3, window_bounds = array<i64: 128, 128>}, {pipeline_mode = #tpu.pipeline_mode<synchronous>, transform_indices = @transform_4, window_bounds = array<i64: 1, 128>}, {pipeline_mode = #tpu.pipeline_mode<synchronous>, transform_indices = @transform_5, window_bounds = array<i64: 128, 128>}, {pipeline_mode = #tpu.pipeline_mode<synchronous>, transform_indices = @transform_6, window_bounds = array<i64: 1, 128>}, {transform_indices = @transform_7, window_bounds = array<i64: 8, 128>}]} {
    %c0 = arith.constant 0 : index
    %c0_0 = arith.constant 0 : index
    %0 = vector.load %arg1[%c0, %c0_0] : memref<8x128xf32, #tpu.memory_space<vmem>>, vector<8x128xf32>
    %c0_1 = arith.constant 0 : index
    %c0_2 = arith.constant 0 : index
    %1 = vector.load %arg2[%c0_1, %c0_2] : memref<128x256xf32, #tpu.memory_space<vmem>>, vector<128x256xf32>
    %cst = arith.constant dense<0.000000e+00> : vector<8x256xf32>
    %2 = tpu.matmul %0, %1, %cst {dimension_numbers = #tpu.dot_dimension_numbers<[1], [0], [0], [1], [0, 0, 1, 1], [], []>} : vector<8x128xf32>, vector<128x256xf32>, vector<8x256xf32> -> vector<8x256xf32>
    %c0_3 = arith.constant 0 : index
    %c0_4 = arith.constant 0 : index
    %3 = vector.load %arg3[%c0_3, %c0_4] : memref<1x256xf32, #tpu.memory_space<vmem>>, vector<1x256xf32>
    %4 = vector.broadcast %3 : vector<1x256xf32> to vector<8x256xf32>
    %5 = arith.addf %2, %4 : vector<8x256xf32>
    %6 = vector.extract_strided_slice %5 {offsets = [0, 0], sizes = [8, 128], strides = [1, 1]} : vector<8x256xf32> to vector<8x128xf32>
    %cst_5 = arith.constant 0.000000e+00 : f32
    %7 = vector.broadcast %cst_5 : f32 to vector<8x128xf32>
    %8 = arith.maximumf %6, %7 : vector<8x128xf32>
    %9 = vector.extract_strided_slice %5 {offsets = [0, 128], sizes = [8, 128], strides = [1, 1]} : vector<8x256xf32> to vector<8x128xf32>
    %c0_6 = arith.constant 0 : index
    %c0_7 = arith.constant 0 : index
    %10 = vector.load %arg4[%c0_6, %c0_7] : memref<128x128xf32, #tpu.memory_space<vmem>>, vector<128x128xf32>
    %cst_8 = arith.constant dense<0.000000e+00> : vector<8x128xf32>
    %11 = tpu.matmul %8, %10, %cst_8 {dimension_numbers = #tpu.dot_dimension_numbers<[1], [0], [0], [1], [0, 0, 1, 1], [], []>} : vector<8x128xf32>, vector<128x128xf32>, vector<8x128xf32> -> vector<8x128xf32>
    %c0_9 = arith.constant 0 : index
    %c0_10 = arith.constant 0 : index
    %12 = vector.load %arg5[%c0_9, %c0_10] : memref<1x128xf32, #tpu.memory_space<vmem>>, vector<1x128xf32>
    %13 = vector.broadcast %12 : vector<1x128xf32> to vector<8x128xf32>
    %14 = arith.addf %11, %13 : vector<8x128xf32>
    %cst_11 = arith.constant 0.000000e+00 : f32
    %15 = vector.broadcast %cst_11 : f32 to vector<8x128xf32>
    %16 = arith.maximumf %14, %15 : vector<8x128xf32>
    %c0_12 = arith.constant 0 : index
    %c0_13 = arith.constant 0 : index
    %17 = vector.load %arg6[%c0_12, %c0_13] : memref<128x128xf32, #tpu.memory_space<vmem>>, vector<128x128xf32>
    %cst_14 = arith.constant dense<0.000000e+00> : vector<8x128xf32>
    %18 = tpu.matmul %16, %17, %cst_14 {dimension_numbers = #tpu.dot_dimension_numbers<[1], [0], [0], [1], [0, 0, 1, 1], [], []>} : vector<8x128xf32>, vector<128x128xf32>, vector<8x128xf32> -> vector<8x128xf32>
    %c0_15 = arith.constant 0 : index
    %c0_16 = arith.constant 0 : index
    %19 = vector.load %arg7[%c0_15, %c0_16] : memref<1x128xf32, #tpu.memory_space<vmem>>, vector<1x128xf32>
    %20 = vector.broadcast %19 : vector<1x128xf32> to vector<8x128xf32>
    %21 = arith.addf %18, %20 : vector<8x128xf32>
    %cst_17 = arith.constant 0.000000e+00 : f32
    %22 = vector.broadcast %cst_17 : f32 to vector<8x128xf32>
    %23 = arith.maximumf %21, %22 : vector<8x128xf32>
    %24 = arith.addf %23, %9 : vector<8x128xf32>
    %c0_18 = arith.constant 0 : index
    %c0_19 = arith.constant 0 : index
    %25 = vector.load %arg8[%c0_18, %c0_19] : memref<8x128xf32, #tpu.memory_space<vmem>>, vector<8x128xf32>
    tpu.vector_store %arg8[%c0_18, %c0_19], %24 {strides = array<i32>} : memref<8x128xf32, #tpu.memory_space<vmem>>, vector<8x128xf32>,
    return
  }
  func.func @transform_0(%arg0: i32) -> (i32, i32) {
    %c0_i32 = arith.constant 0 : i32
    %c0_i32_0 = arith.constant 0 : i32
    return %arg0, %c0_i32 : i32, i32
  }
  func.func @transform_1(%arg0: i32) -> (i32, i32) {
    %c0_i32 = arith.constant 0 : i32
    %c0_i32_0 = arith.constant 0 : i32
    %c0_i32_1 = arith.constant 0 : i32
    return %c0_i32, %c0_i32_0 : i32, i32
  }
  func.func @transform_2(%arg0: i32) -> (i32, i32) {
    %c0_i32 = arith.constant 0 : i32
    %c0_i32_0 = arith.constant 0 : i32
    %c0_i32_1 = arith.constant 0 : i32
    return %c0_i32, %c0_i32_0 : i32, i32
  }
  func.func @transform_3(%arg0: i32) -> (i32, i32) {
    %c0_i32 = arith.constant 0 : i32
    %c0_i32_0 = arith.constant 0 : i32
    %c0_i32_1 = arith.constant 0 : i32
    return %c0_i32, %c0_i32_0 : i32, i32
  }
  func.func @transform_4(%arg0: i32) -> (i32, i32) {
    %c0_i32 = arith.constant 0 : i32
    %c0_i32_0 = arith.constant 0 : i32
    %c0_i32_1 = arith.constant 0 : i32
    return %c0_i32, %c0_i32_0 : i32, i32
  }
  func.func @transform_5(%arg0: i32) -> (i32, i32) {
    %c0_i32 = arith.constant 0 : i32
    %c0_i32_0 = arith.constant 0 : i32
    %c0_i32_1 = arith.constant 0 : i32
    return %c0_i32, %c0_i32_0 : i32, i32
  }
  func.func @transform_6(%arg0: i32) -> (i32, i32) {
    %c0_i32 = arith.constant 0 : i32
    %c0_i32_0 = arith.constant 0 : i32
    %c0_i32_1 = arith.constant 0 : i32
    return %c0_i32, %c0_i32_0 : i32, i32
  }
  func.func @transform_7(%arg0: i32) -> (i32, i32) {
    %c0_i32 = arith.constant 0 : i32
    %c0_i32_0 = arith.constant 0 : i32
    return %arg0, %c0_i32 : i32, i32
  }
}

module attributes {stable_mosaic.version = 11 : i64} {
  func.func @_mlp_kernel(%arg0: i32, %arg1: memref<8x128xf32, #tpu.memory_space<vmem>>, %arg2: memref<128x256xf32, #tpu.memory_space<vmem>>, %arg3: memref<1x256xf32, #tpu.memory_space<vmem>>, %arg4: memref<128x128xf32, #tpu.memory_space<vmem>>, %arg5: memref<1x128xf32, #tpu.memory_space<vmem>>, %arg6: memref<128x128xf32, #tpu.memory_space<vmem>>, %arg7: memref<1x128xf32, #tpu.memory_space<vmem>>, %arg8: memref<8x128xf32, #tpu.memory_space<vmem>>) attributes {dimension_semantics = [#tpu.dimension_semantics<parallel>], iteration_bounds = array<i64: 1>, scalar_prefetch = 0 : i64, scratch_operands = 0 : i64, tpu.core_type = #tpu.core_type<tc>, window_params = [{transform_indices = @transform_0, window_bounds = array<i64: 8, 128>}, {pipeline_mode = #tpu.pipeline_mode<synchronous>, transform_indices = @transform_1, window_bounds = array<i64: 128, 256>}, {pipeline_mode = #tpu.pipeline_mode<synchronous>, transform_indices = @transform_2, window_bounds = array<i64: 1, 256>}, {pipeline_mode = #tpu.pipeline_mode<synchronous>, transform_indices = @transform_3, window_bounds = array<i64: 128, 128>}, {pipeline_mode = #tpu.pipeline_mode<synchronous>, transform_indices = @transform_4, window_bounds = array<i64: 1, 128>}, {pipeline_mode = #tpu.pipeline_mode<synchronous>, transform_indices = @transform_5, window_bounds = array<i64: 128, 128>}, {pipeline_mode = #tpu.pipeline_mode<synchronous>, transform_indices = @transform_6, window_bounds = array<i64: 1, 128>}, {transform_indices = @transform_7, window_bounds = array<i64: 8, 128>}]} {
    %c0 = arith.constant 0 : index
    %c0_0 = arith.constant 0 : index
    %0 = vector.load %arg1[%c0, %c0_0] : memref<8x128xf32, #tpu.memory_space<vmem>>, vector<8x128xf32>
    %c0_1 = arith.constant 0 : index
    %c0_2 = arith.constant 0 : index
    %1 = vector.load %arg2[%c0_1, %c0_2] : memref<128x256xf32, #tpu.memory_space<vmem>>, vector<128x256xf32>
    %cst = arith.constant dense<0.000000e+00> : vector<8x256xf32>
    %2 = tpu.matmul %0, %1, %cst {dimension_numbers = #tpu.dot_dimension_numbers<[1], [0], [0], [1], [0, 0, 1, 1], [], []>} : vector<8x128xf32>, vector<128x256xf32>, vector<8x256xf32> -> vector<8x256xf32>
    %c0_3 = arith.constant 0 : index
    %c0_4 = arith.constant 0 : index
    %3 = vector.load %arg3[%c0_3, %c0_4] : memref<1x256xf32, #tpu.memory_space<vmem>>, vector<1x256xf32>
    %4 = vector.broadcast %3 : vector<1x256xf32> to vector<8x256xf32>
    %5 = arith.addf %2, %4 : vector<8x256xf32>
    %6 = vector.extract_strided_slice %5 {offsets = [0, 0], sizes = [8, 128], strides = [1, 1]} : vector<8x256xf32> to vector<8x128xf32>
    %cst_5 = arith.constant 0.000000e+00 : f32
    %7 = vector.broadcast %cst_5 : f32 to vector<8x128xf32>
    %8 = arith.maximumf %6, %7 : vector<8x128xf32>
    %9 = vector.extract_strided_slice %5 {offsets = [0, 128], sizes = [8, 128], strides = [1, 1]} : vector<8x256xf32> to vector<8x128xf32>
    %c0_6 = arith.constant 0 : index
    %c0_7 = arith.constant 0 : index
    %10 = vector.load %arg4[%c0_6, %c0_7] : memref<128x128xf32, #tpu.memory_space<vmem>>, vector<128x128xf32>
    %cst_8 = arith.constant dense<0.000000e+00> : vector<8x128xf32>
    %11 = tpu.matmul %8, %10, %cst_8 {dimension_numbers = #tpu.dot_dimension_numbers<[1], [0], [0], [1], [0, 0, 1, 1], [], []>} : vector<8x128xf32>, vector<128x128xf32>, vector<8x128xf32> -> vector<8x128xf32>
    %c0_9 = arith.constant 0 : index
    %c0_10 = arith.constant 0 : index
    %12 = vector.load %arg5[%c0_9, %c0_10] : memref<1x128xf32, #tpu.memory_space<vmem>>, vector<1x128xf32>
    %13 = vector.broadcast %12 : vector<1x128xf32> to vector<8x128xf32>
    %14 = arith.addf %11, %13 : vector<8x128xf32>
    %cst_11 = arith.constant 0.000000e+00 : f32
    %15 = vector.broadcast %cst_11 : f32 to vector<8x128xf32>
    %16 = arith.maximumf %14, %15 : vector<8x128xf32>
    %c0_12 = arith.constant 0 : index
    %c0_13 = arith.constant 0 : index
    %17 = vector.load %arg6[%c0_12, %c0_13] : memref<128x128xf32, #tpu.memory_space<vmem>>, vector<128x128xf32>
    %cst_14 = arith.constant dense<0.000000e+00> : vector<8x128xf32>
    %18 = tpu.matmul %16, %17, %cst_14 {dimension_numbers = #tpu.dot_dimension_numbers<[1], [0], [0], [1], [0, 0, 1, 1], [], []>} : vector<8x128xf32>, vector<128x128xf32>, vector<8x128xf32> -> vector<8x128xf32>
    %c0_15 = arith.constant 0 : index
    %c0_16 = arith.constant 0 : index
    %19 = vector.load %arg7[%c0_15, %c0_16] : memref<1x128xf32, #tpu.memory_space<vmem>>, vector<1x128xf32>
    %20 = vector.broadcast %19 : vector<1x128xf32> to vector<8x128xf32>
    %21 = arith.addf %18, %20 : vector<8x128xf32>
    %cst_17 = arith.constant 0.000000e+00 : f32
    %22 = vector.broadcast %cst_17 : f32 to vector<8x128xf32>
    %23 = arith.maximumf %21, %22 : vector<8x128xf32>
    %24 = arith.addf %23, %9 : vector<8x128xf32>
    %c0_18 = arith.constant 0 : index
    %c0_19 = arith.constant 0 : index
    %25 = vector.load %arg8[%c0_18, %c0_19] : memref<8x128xf32, #tpu.memory_space<vmem>>, vector<8x128xf32>
    tpu.vector_store %arg8[%c0_18, %c0_19], %24 {strides = array<i32>} : memref<8x128xf32, #tpu.memory_space<vmem>>, vector<8x128xf32>,
    return
  }
  func.func @transform_0(%arg0: i32) -> (i32, i32) {
    %c0_i32 = arith.constant 0 : i32
    %c0_i32_0 = arith.constant 0 : i32
    return %arg0, %c0_i32 : i32, i32
  }
  func.func @transform_1(%arg0: i32) -> (i32, i32) {
    %c0_i32 = arith.constant 0 : i32
    %c0_i32_0 = arith.constant 0 : i32
    %c0_i32_1 = arith.constant 0 : i32
    return %c0_i32, %c0_i32_0 : i32, i32
  }
  func.func @transform_2(%arg0: i32) -> (i32, i32) {
    %c0_i32 = arith.constant 0 : i32
    %c0_i32_0 = arith.constant 0 : i32
    %c0_i32_1 = arith.constant 0 : i32
    return %c0_i32, %c0_i32_0 : i32, i32
  }
  func.func @transform_3(%arg0: i32) -> (i32, i32) {
    %c0_i32 = arith.constant 0 : i32
    %c0_i32_0 = arith.constant 0 : i32
    %c0_i32_1 = arith.constant 0 : i32
    return %c0_i32, %c0_i32_0 : i32, i32
  }
  func.func @transform_4(%arg0: i32) -> (i32, i32) {
    %c0_i32 = arith.constant 0 : i32
    %c0_i32_0 = arith.constant 0 : i32
    %c0_i32_1 = arith.constant 0 : i32
    return %c0_i32, %c0_i32_0 : i32, i32
  }
  func.func @transform_5(%arg0: i32) -> (i32, i32) {
    %c0_i32 = arith.constant 0 : i32
    %c0_i32_0 = arith.constant 0 : i32
    %c0_i32_1 = arith.constant 0 : i32
    return %c0_i32, %c0_i32_0 : i32, i32
  }
  func.func @transform_6(%arg0: i32) -> (i32, i32) {
    %c0_i32 = arith.constant 0 : i32
    %c0_i32_0 = arith.constant 0 : i32
    %c0_i32_1 = arith.constant 0 : i32
    return %c0_i32, %c0_i32_0 : i32, i32
  }
  func.func @transform_7(%arg0: i32) -> (i32, i32) {
    %c0_i32 = arith.constant 0 : i32
    %c0_i32_0 = arith.constant 0 : i32
    return %arg0, %c0_i32 : i32, i32
  }
}

</mosaic_0001>

<bundles_post_ra>
// kernel: mlp_forward_packed.1
= control target key start
LH: loop header
LB: loop body
LE: loop exit
PB: predicated region body
PF: predicated region fallthrough
CT: control target
= control target key end

     0   :  { %12 = vsyncpa [#allocation3], 0  ;;  %s772_s0 = inlined_call_operand.vmem [shape: f32[8,128], index: 0, kind: input, shape index: {}]   ;;  %s773_s1 = inlined_call_operand.hbm [shape: f32[128,256], index: 1, kind: input, shape index: {}]   ;;  %s774_s2 = inlined_call_operand.vmem [shape: f32[1,256], index: 2, kind: input, shape index: {}]   ;;  %s775_s3 = inlined_call_operand.hbm [shape: f32[128,128], index: 3, kind: input, shape index: {}]   ;;  %s776_s4 = inlined_call_operand.vmem [shape: f32[1,128], index: 4, kind: input, shape index: {}]   ;;  %s777_s5 = inlined_call_operand.hbm [shape: f32[128,128], index: 5, kind: input, shape index: {}]   ;;  %s778_s6 = inlined_call_operand.vmem [shape: f32[1,128], index: 6, kind: input, shape index: {}]   ;;  %s779_s7 = inlined_call_operand.vmem [shape: f32[8,128], index: 7, kind: output, shape index: {}]  }
   0x1   :  { %13 = vsyncpa [#allocation5], 0  ;;  %s646_s24 = smov [#allocation4]   ;;  %s576_s28 = scalar_lea.hbm %s775_s3, 2048 }
   0x2   :  { %s35_s25 = sshll.u32 %s646_s24, 4  ;;  %p577_p0 = scmp.ne.s32.totalorder %s775_s3, %s576_s28  ;;  %s36_s25 = int_to_ptr.vmem [resolvable:$true] %s35_s25 }
   0x3   :  { %p580_p1 = scmp.lt.u32.totalorder %s576_s28, %s775_s3 }
   0x5   :  { %p582_p2 = pnand %p580_p1, %p577_p0 }
   0x7   :  { %585 = shalt.err (!%p582_p2)
}
   0x8   :  { %s586_s10 = scalar_lea.vmem %s36_s25, 2048  ;;  %p591_p4 = scmp.lt.s32.totalorder %s36_s25, %s36_s25 }
   0x9   :  { %p587_p3 = scmp.ne.s32.totalorder %s36_s25, %s586_s10  ;;  %p592_p5 = scmp.lt.s32.totalorder %s586_s10, %s586_s10 }
   0xb   :  { %p593_p6 = por %p592_p5, %p591_p4 }
   0xd   :  { %p594_p7 = pnand %p593_p6, %p587_p3 }
   0xf   :  { %597 = shalt.err (!%p594_p7)
}
  0x10   :  { %s647_s11 = smov 128   ;;  %s648_s12 = smov 8  }
  0x11   :  { %41 = dma.hbm_to_vmem [thread:$0]  %s775_s3, 2048, %s36_s25, [#allocation5], %s647_s11, %s647_s11, %s648_s12  }
  0x12   :  { %s649_s15 = smov [#allocation2]   ;;  %s598_s19 = scalar_lea.hbm %s773_s1, 4096 }
  0x13   :  { %s21_s16 = sshll.u32 %s649_s15, 4  ;;  %p599_p8 = scmp.ne.s32.totalorder %s773_s1, %s598_s19  ;;  %s22_s16 = int_to_ptr.vmem [resolvable:$true] %s21_s16 }
  0x14   :  { %p602_p9 = scmp.lt.u32.totalorder %s598_s19, %s773_s1 }
  0x16   :  { %p604_p10 = pnand %p602_p9, %p599_p8 }
  0x18   :  { %607 = shalt.err (!%p604_p10)
}
  0x19   :  { %s608_s24 = scalar_lea.vmem %s22_s16, 4096  ;;  %p613_p12 = scmp.lt.s32.totalorder %s22_s16, %s22_s16 }
  0x1a   :  { %p609_p11 = scmp.ne.s32.totalorder %s22_s16, %s608_s24  ;;  %p614_p13 = scmp.lt.s32.totalorder %s608_s24, %s608_s24 }
  0x1c   :  { %p615_p0 = por %p614_p13, %p613_p12 }
  0x1e   :  { %p616_p1 = pnand %p615_p0, %p609_p11 }
  0x20   :  { %619 = shalt.err (!%p616_p1)
}
  0x21   :  { %s650_s3 = smov 256   ;;  %s651_s25 = smov 16  }
  0x22   :  { %27 = dma.hbm_to_vmem [thread:$0]  %s773_s1, 4096, %s22_s16, [#allocation3], %s650_s3, %s650_s3, %s651_s25  }
  0x23   :  { %s652_s28 = smov [#allocation6]   ;;  %s620_s9 = scalar_lea.hbm %s777_s5, 2048 }
  0x24   :  { %s49_s29 = sshll.u32 %s652_s28, 4  ;;  %p621_p2 = scmp.ne.s32.totalorder %s777_s5, %s620_s9  ;;  %s50_s29 = int_to_ptr.vmem [resolvable:$true] %s49_s29 }
  0x25   :  { %p624_p3 = scmp.lt.u32.totalorder %s620_s9, %s777_s5 }
  0x27   :  { %p626_p4 = pnand %p624_p3, %p621_p2 }
  0x29   :  { %629 = shalt.err (!%p626_p4)
}
  0x2a   :  { %s630_s17 = scalar_lea.vmem %s50_s29, 2048  ;;  %p635_p6 = scmp.lt.s32.totalorder %s50_s29, %s50_s29 }
  0x2b   :  { %p631_p5 = scmp.ne.s32.totalorder %s50_s29, %s630_s17  ;;  %p636_p7 = scmp.lt.s32.totalorder %s630_s17, %s630_s17 }
  0x2d   :  { %p637_p8 = por %p636_p7, %p635_p6 }
  0x2f   :  { %p638_p9 = pnand %p637_p8, %p631_p5 }
  0x31   :  { %641 = shalt.err (!%p638_p9)
}
  0x32   :  { %55 = dma.hbm_to_vmem [thread:$0]  %s777_s5, 2048, %s50_s29, [#allocation5], %s647_s11, %s647_s11, %s648_s12  }
  0x33   :  { %642 = dma.done.wait [#allocation3], 4096  }
  0x34   :  { %643 = vsyncadd [#allocation3], 4294963200 }
  0x35   :  { %644 = dma.done.wait [#allocation5], 4096  }
  0x36   :  { %645 = vsyncadd [#allocation5], 4294963200  ;;  %v653_v0 = vmov 0.0   ;;  %v654_v1 = vmov 0.0|0.0   ;;  %v69_v2 = vld [vmem:[#allocation2 + $0x8] sm:$0xff]  ;;  %v71_v3 = vld [vmem:[#allocation2 + $0x18] sm:$0xff] }
  0x37   :  { %176 = vmatprep.mubr.f32.mxu0 %v653_v0  ;;  %518 = vmatprep.subr.bf16.mxu1 %v654_v1  ;;  %v68_v4 = vld [vmem:[#allocation2] sm:$0xff]  ;;  %v486_v5 = vpack.c.bf16 %v71_v3, %v69_v2  ;;  %v70_v6 = vld [vmem:[#allocation2 + $0x10] sm:$0xff]  ;;  %v73_v7 = vld [vmem:[#allocation2 + $0x28] sm:$0xff]  ;;  %vm655_vm0 = vmmov 0  }
  0x38   :  { %v75_v8 = vld [vmem:[#allocation2 + $0x38] sm:$0xff]  ;;  %v488_v9 = vpack.c.bf16 %v70_v6, %v68_v4  ;;  %v72_v11 = vld [vmem:[#allocation2 + $0x20] sm:$0xff]  ;;  %v74_v12 = vld [vmem:[#allocation2 + $0x30] sm:$0xff]  ;;  %448 = vmatprep.mubr.msk.f32.mxu1 %vm655_vm0, %v653_v0 }
  0x39   :  { %v490_v10 = vpack.c.bf16 %v75_v8, %v73_v7  ;;  %v77_v13 = vld [vmem:[#allocation2 + $0x48] sm:$0xff]  ;;  %487 = vmatprep.subr.bf16.mxu0 %v486_v5  ;;  %v79_v14 = vld [vmem:[#allocation2 + $0x58] sm:$0xff]  ;;  %v492_v15 = vpack.c.bf16 %v74_v12, %v72_v11  ;;  %v76_v17 = vld [vmem:[#allocation2 + $0x40] sm:$0xff] }
  0x3a   :  { %489 = vmatpush1.bf16.msra.mxu0 %v488_v9  ;;  %v494_v16 = vpack.c.bf16 %v79_v14, %v77_v13  ;;  %v78_v18 = vld [vmem:[#allocation2 + $0x50] sm:$0xff]  ;;  %v81_v19 = vld [vmem:[#allocation2 + $0x68] sm:$0xff]  ;;  %v83_v20 = vld [vmem:[#allocation2 + $0x78] sm:$0xff] }
  0x3b   :  { %491 = vmatprep.subr.bf16.mxu0 %v490_v10  ;;  %v496_v21 = vpack.c.bf16 %v78_v18, %v76_v17  ;;  %v498_v22 = vpack.c.bf16 %v83_v20, %v81_v19  ;;  %v80_v23 = vld [vmem:[#allocation2 + $0x60] sm:$0xff]  ;;  %v82_v24 = vld [vmem:[#allocation2 + $0x70] sm:$0xff]  ;;  %v85_v25 = vld [vmem:[#allocation2 + $0x88] sm:$0xff] }
  0x3c   :  { %v87_v26 = vld [vmem:[#allocation2 + $0x98] sm:$0xff]  ;;  %v184_v27 = vld [vmem:[#allocation4] sm:$0xff]  ;;  %v185_v28 = vld [vmem:[#allocation4 + $0x8] sm:$0xff]  ;;  %v500_v30 = vpack.c.bf16 %v82_v24, %v80_v23 }
  0x3d   :  { %v186_v29 = vld [vmem:[#allocation4 + $0x10] sm:$0xff]  ;;  %v519_v31 = vpack.c.bf16 %v185_v28, %v184_v27  ;;  %v187_v32 = vld [vmem:[#allocation4 + $0x18] sm:$0xff]  ;;  %v502_v33 = vpack.c.bf16 %v87_v26, %v85_v25  ;;  %v84_v34 = vld [vmem:[#allocation2 + $0x80] sm:$0xff] }
  0x3e   :  { %493 = vmatpush1.bf16.msra.mxu0 %v492_v15  ;;  %v86_v35 = vld [vmem:[#allocation2 + $0x90] sm:$0xff]  ;;  %v89_v36 = vld [vmem:[#allocation2 + $0xa8] sm:$0xff]  ;;  %v91_v37 = vld [vmem:[#allocation2 + $0xb8] sm:$0xff]  ;;  %v522_v38 = vpack.c.bf16 %v187_v32, %v186_v29 }
  0x3f   :  { %495 = vmatprep.subr.bf16.mxu0 %v494_v16  ;;  %520 = vmatpush3.bf16.msra.mxu1 %v519_v31  ;;  %v188_v39 = vld [vmem:[#allocation4 + $0x20] sm:$0xff]  ;;  %v189_v40 = vld [vmem:[#allocation4 + $0x28] sm:$0xff]  ;;  %v504_v41 = vpack.c.bf16 %v86_v35, %v84_v34  ;;  %v506_v42 = vpack.c.bf16 %v91_v37, %v89_v36  ;;  %v90_v44 = vld [vmem:[#allocation2 + $0xb0] sm:$0xff] }
  0x40   :  { %521 = vmatprep.subr.bf16.mxu1 %v654_v1  ;;  %v88_v43 = vld [vmem:[#allocation2 + $0xa0] sm:$0xff]  ;;  %v93_v45 = vld [vmem:[#allocation2 + $0xc8] sm:$0xff]  ;;  %v95_v46 = vld [vmem:[#allocation2 + $0xd8] sm:$0xff]  ;;  %v525_v47 = vpack.c.bf16 %v189_v40, %v188_v39 }
  0x41   :  { %v190_v48 = vld [vmem:[#allocation4 + $0x30] sm:$0xff]  ;;  %v191_v49 = vld [vmem:[#allocation4 + $0x38] sm:$0xff]  ;;  %v508_v50 = vpack.c.bf16 %v90_v44, %v88_v43  ;;  %v510_v51 = vpack.c.bf16 %v95_v46, %v93_v45  ;;  %v92_v52 = vld [vmem:[#allocation2 + $0xc0] sm:$0xff] }
  0x42   :  { %497 = vmatpush1.bf16.msra.mxu0 %v496_v21  ;;  %v94_v53 = vld [vmem:[#allocation2 + $0xd0] sm:$0xff]  ;;  %v97_v54 = vld [vmem:[#allocation2 + $0xe8] sm:$0xff]  ;;  %v99_v55 = vld [vmem:[#allocation2 + $0xf8] sm:$0xff]  ;;  %v528_v56 = vpack.c.bf16 %v191_v49, %v190_v48 }
  0x43   :  { %499 = vmatprep.subr.bf16.mxu0 %v498_v22  ;;  %523 = vmatpush3.bf16.msra.mxu1 %v522_v38  ;;  %v192_v57 = vld [vmem:[#allocation4 + $0x40] sm:$0xff]  ;;  %v193_v58 = vld [vmem:[#allocation4 + $0x48] sm:$0xff]  ;;  %v512_v59 = vpack.c.bf16 %v94_v53, %v92_v52  ;;  %v514_v60 = vpack.c.bf16 %v99_v55, %v97_v54  ;;  %v98_v62 = vld [vmem:[#allocation2 + $0xf0] sm:$0xff] }
  0x44   :  { %524 = vmatprep.subr.bf16.mxu1 %v654_v1  ;;  %v96_v61 = vld [vmem:[#allocation2 + $0xe0] sm:$0xff]  ;;  %v531_v63 = vpack.c.bf16 %v193_v58, %v192_v57  ;;  %v194_v2 = vld [vmem:[#allocation4 + $0x50] sm:$0xff]  ;;  %v195_v3 = vld [vmem:[#allocation4 + $0x58] sm:$0xff] }
  0x45   :  { %v516_v4 = vpack.c.bf16 %v98_v62, %v96_v61  ;;  %v534_v5 = vpack.c.bf16 %v195_v3, %v194_v2  ;;  %v196_v6 = vld [vmem:[#allocation4 + $0x60] sm:$0xff]  ;;  %v197_v7 = vld [vmem:[#allocation4 + $0x68] sm:$0xff]  ;;  %v198_v10 = vld [vmem:[#allocation4 + $0x70] sm:$0xff] }
  0x46   :  { %501 = vmatpush1.bf16.msra.mxu0 %v500_v30  ;;  %v67_v8 = vld [vmem:[%s772_s0] sm:$0xff]  ;;  %v537_v9 = vpack.c.bf16 %v197_v7, %v196_v6  ;;  %v199_v11 = vld [vmem:[#allocation4 + $0x78] sm:$0xff]  ;;  %v279_v14 = vld [vmem:[#allocation6 + $0x8] sm:$0xff] }
  0x47   :  { %503 = vmatprep.subr.bf16.mxu0 %v502_v33  ;;  %526 = vmatpush3.bf16.msra.mxu1 %v525_v47  ;;  %v540_v12 = vpack.c.bf16 %v199_v11, %v198_v10  ;;  %v278_v13 = vld [vmem:[#allocation6] sm:$0xff]  ;;  %v280_v15 = vld [vmem:[#allocation6 + $0x10] sm:$0xff]  ;;  %v281_v17 = vld [vmem:[#allocation6 + $0x18] sm:$0xff]  ;;  %v102_v33 = vlaneseq }
  0x48   :  { %527 = vmatprep.subr.bf16.mxu1 %v654_v1  ;;  %v543_v16 = vpack.c.bf16 %v279_v14, %v278_v13  ;;  %v546_v18 = vpack.c.bf16 %v281_v17, %v280_v15  ;;  %v282_v19 = vld [vmem:[#allocation6 + $0x20] sm:$0xff]  ;;  %v283_v20 = vld [vmem:[#allocation6 + $0x28] sm:$0xff]  ;;  %v284_v22 = vld [vmem:[#allocation6 + $0x30] sm:$0xff] }
  0x49   :  { %v549_v21 = vpack.c.bf16 %v283_v20, %v282_v19  ;;  %v285_v23 = vld [vmem:[#allocation6 + $0x38] sm:$0xff]  ;;  %v287_v25 = vld [vmem:[#allocation6 + $0x48] sm:$0xff]  ;;  %v288_v27 = vld [vmem:[#allocation6 + $0x50] sm:$0xff]  ;;  %v103_v34 = vshrl.u32 %v102_v33, 7 }
  0x4a   :  { %505 = vmatpush1.bf16.msra.mxu0 %v504_v41  ;;  %v552_v24 = vpack.c.bf16 %v285_v23, %v284_v22  ;;  %v289_v28 = vld [vmem:[#allocation6 + $0x58] sm:$0xff]  ;;  %v290_v30 = vld [vmem:[#allocation6 + $0x60] sm:$0xff]  ;;  %v291_v31 = vld [vmem:[#allocation6 + $0x68] sm:$0xff] }
  0x4b   :  { %507 = vmatprep.subr.bf16.mxu0 %v506_v42  ;;  %529 = vmatpush3.bf16.msra.mxu1 %v528_v56  ;;  %v558_v29 = vpack.c.bf16 %v289_v28, %v288_v27  ;;  %v561_v32 = vpack.c.bf16 %v291_v31, %v290_v30  ;;  %v104_v35 = vsub.s32 0, %v103_v34  ;;  %v100_v36 = vld [vmem:[%s774_s2] sm:$0x3]  ;;  %v292_v42 = vld [vmem:[#allocation6 + $0x70] sm:$0xff]  ;;  %v293_v43 = vld [vmem:[#allocation6 + $0x78] sm:$0xff]  ;;  %v108_v49 = vsub.s32 1, %v103_v34 }
  0x4c   :  { %530 = vmatprep.subr.bf16.mxu1 %v654_v1  ;;  %v564_v44 = vpack.c.bf16 %v293_v43, %v292_v42 }
  0x4d   :  { %v105_v37 = vrot.slane %v100_v36, %v104_v35 }
  0x4e   :  { %509 = vmatpush1.bf16.msra.mxu0 %v508_v50  ;;  %v381_v50 = vld [vmem:[%s778_s6] ss:$0 sm:$0xff] }
  0x4f   :  { %511 = vmatprep.subr.bf16.mxu0 %v510_v51  ;;  %532 = vmatpush3.bf16.msra.mxu1 %v531_v63  ;;  %v109_v51 = vrot.slane %v100_v36, %v108_v49 }
  0x50   :  { %533 = vmatprep.subr.bf16.mxu1 %v654_v1 }
  0x52   :  { %513 = vmatpush1.bf16.msra.mxu0 %v512_v59 }
  0x53   :  { %515 = vmatprep.subr.bf16.mxu0 %v514_v60  ;;  %535 = vmatpush3.bf16.msra.mxu1 %v534_v5 }
  0x54   :  { %536 = vmatprep.subr.bf16.mxu1 %v654_v1 }
  0x56   :  { %517 = vmatpush1.bf16.msra.mxu0 %v516_v4 }
  0x57   :  { %542 = vmatprep.subr.bf16.mxu0 %v654_v1  ;;  %538 = vmatpush3.bf16.msra.mxu1 %v537_v9 }
  0x58   :  { %539 = vmatprep.subr.bf16.mxu1 %v654_v1 }
  0x59   :  { %177 = vmatmul.mubr.f32.vlgmr.msra.gmra.mrb[0].mxu0 %v67_v8 }
  0x5a   :  { %483 = vmatprep.mubr.msk.f32.mxu0 %vm655_vm0, %v653_v0  ;;  %544 = vmatpush3.bf16.msra.mxu0 %v543_v16  ;;  %v286_v0 = vld [vmem:[#allocation6 + $0x40] sm:$0xff] }
  0x5b   :  { %541 = vmatpush3.bf16.msra.mxu1 %v540_v12  ;;  %545 = vmatprep.subr.bf16.mxu0 %v654_v1  ;;  %v555_v26 = vpack.c.bf16 %v287_v25, %v286_v0 }
  0x5e   :  { %547 = vmatpush3.bf16.msra.mxu0 %v546_v18 }
  0x5f   :  { %548 = vmatprep.subr.bf16.mxu0 %v654_v1 }
  0x62   :  { %550 = vmatpush3.bf16.msra.mxu0 %v549_v21 }
  0x63   :  { %551 = vmatprep.subr.bf16.mxu0 %v654_v1 }
  0x66   :  { %553 = vmatpush3.bf16.msra.mxu0 %v552_v24 }
  0x67   :  { %554 = vmatprep.subr.bf16.mxu0 %v654_v1 }
  0x6a   :  { %556 = vmatpush3.bf16.msra.mxu0 %v555_v26 }
  0x6b   :  { %557 = vmatprep.subr.bf16.mxu0 %v654_v1 }
  0x6e   :  { %559 = vmatpush3.bf16.msra.mxu0 %v558_v29 }
  0x6f   :  { %560 = vmatprep.subr.bf16.mxu0 %v654_v1 }
  0x72   :  { %562 = vmatpush3.bf16.msra.mxu0 %v561_v32 }
  0x73   :  { %563 = vmatprep.subr.bf16.mxu0 %v654_v1  ;;  %v380_v1 = vld [vmem:[%s776_s4] ss:$0 sm:$0xff] }
  0x76   :  { %565 = vmatpush3.bf16.msra.mxu0 %v564_v44 }
 0x12c   :  { %v178_v38 = vpop.f32.mrb[0].mxu0 }
 0x12d   :  { %v179_v39 = vadd.f32 %v178_v38, %v105_v37  ;;  %v180_v40 = vpop.f32.mrb[1].mxu0 }
 0x12e   :  { %v181_v55 = vadd.f32 %v180_v40, %v109_v51 }
 0x12f   :  { %v183_v41 = vmax.f32 %v179_v39, 0.0 }
 0x131   :  { %449 = vmatmul.mubr.f32.vlgmr.msra.gmra.mrb[0].mxu1 %v183_v41 }
 0x204   :  { %v273_v45 = vpop.f32.mrb[0].mxu1 }
 0x205   :  { %v274_v46 = vadd.f32 %v380_v1, %v273_v45  ;;  %v450_v47 = vpop.f32.mrb[1].mxu1 }
 0x207   :  { %v277_v48 = vmax.f32 %v274_v46, 0.0 }
 0x209   :  { %484 = vmatmul.mubr.f32.vlgmr.msra.gmra.mrb[2].mxu0 %v277_v48 }
 0x2dc   :  { %v367_v52 = vpop.f32.mrb[2].mxu0 }
 0x2dd   :  { %v368_v53 = vadd.f32 %v381_v50, %v367_v52  ;;  %v485_v54 = vpop.f32.mrb[3].mxu0 }
 0x2df   :  { %v371_v56 = vmax.f32 %v368_v53, 0.0 }
 0x2e1   :  { %v372_v57 = vadd.f32 %v371_v56, %v181_v55 }
 0x2e3   :  { %373 = vst [vmem:[%s779_s7] sm:$0xff] %v372_v57 }
 0x2e4   :  { %378 = vsyncpa [#allocation3], 1 }
 0x2e5   :  { %379 = vsyncpa [#allocation5], 1 }

// kernel: mlp_forward_packed.1
= control target key start
LH: loop header
LB: loop body
LE: loop exit
PB: predicated region body
PF: predicated region fallthrough
CT: control target
= control target key end

     0   :  { %12 = vsyncpa [#allocation3], 0  ;;  %s772_s0 = inlined_call_operand.vmem [shape: f32[8,128], index: 0, kind: input, shape index: {}]   ;;  %s773_s1 = inlined_call_operand.hbm [shape: f32[128,256], index: 1, kind: input, shape index: {}]   ;;  %s774_s2 = inlined_call_operand.vmem [shape: f32[1,256], index: 2, kind: input, shape index: {}]   ;;  %s775_s3 = inlined_call_operand.hbm [shape: f32[128,128], index: 3, kind: input, shape index: {}]   ;;  %s776_s4 = inlined_call_operand.vmem [shape: f32[1,128], index: 4, kind: input, shape index: {}]   ;;  %s777_s5 = inlined_call_operand.hbm [shape: f32[128,128], index: 5, kind: input, shape index: {}]   ;;  %s778_s6 = inlined_call_operand.vmem [shape: f32[1,128], index: 6, kind: input, shape index: {}]   ;;  %s779_s7 = inlined_call_operand.vmem [shape: f32[8,128], index: 7, kind: output, shape index: {}]  }
   0x1   :  { %13 = vsyncpa [#allocation5], 0  ;;  %s646_s24 = smov [#allocation4]   ;;  %s576_s28 = scalar_lea.hbm %s775_s3, 2048 }
   0x2   :  { %s35_s25 = sshll.u32 %s646_s24, 4  ;;  %p577_p0 = scmp.ne.s32.totalorder %s775_s3, %s576_s28  ;;  %s36_s25 = int_to_ptr.vmem [resolvable:$true] %s35_s25 }
   0x3   :  { %p580_p1 = scmp.lt.u32.totalorder %s576_s28, %s775_s3 }
   0x5   :  { %p582_p2 = pnand %p580_p1, %p577_p0 }
   0x7   :  { %585 = shalt.err (!%p582_p2)
}
   0x8   :  { %s586_s10 = scalar_lea.vmem %s36_s25, 2048  ;;  %p591_p4 = scmp.lt.s32.totalorder %s36_s25, %s36_s25 }
   0x9   :  { %p587_p3 = scmp.ne.s32.totalorder %s36_s25, %s586_s10  ;;  %p592_p5 = scmp.lt.s32.totalorder %s586_s10, %s586_s10 }
   0xb   :  { %p593_p6 = por %p592_p5, %p591_p4 }
   0xd   :  { %p594_p7 = pnand %p593_p6, %p587_p3 }
   0xf   :  { %597 = shalt.err (!%p594_p7)
}
  0x10   :  { %s647_s11 = smov 128   ;;  %s648_s12 = smov 8  }
  0x11   :  { %41 = dma.hbm_to_vmem [thread:$0]  %s775_s3, 2048, %s36_s25, [#allocation5], %s647_s11, %s647_s11, %s648_s12  }
  0x12   :  { %s649_s15 = smov [#allocation2]   ;;  %s598_s19 = scalar_lea.hbm %s773_s1, 4096 }
  0x13   :  { %s21_s16 = sshll.u32 %s649_s15, 4  ;;  %p599_p8 = scmp.ne.s32.totalorder %s773_s1, %s598_s19  ;;  %s22_s16 = int_to_ptr.vmem [resolvable:$true] %s21_s16 }
  0x14   :  { %p602_p9 = scmp.lt.u32.totalorder %s598_s19, %s773_s1 }
  0x16   :  { %p604_p10 = pnand %p602_p9, %p599_p8 }
  0x18   :  { %607 = shalt.err (!%p604_p10)
}
  0x19   :  { %s608_s24 = scalar_lea.vmem %s22_s16, 4096  ;;  %p613_p12 = scmp.lt.s32.totalorder %s22_s16, %s22_s16 }
  0x1a   :  { %p609_p11 = scmp.ne.s32.totalorder %s22_s16, %s608_s24  ;;  %p614_p13 = scmp.lt.s32.totalorder %s608_s24, %s608_s24 }
  0x1c   :  { %p615_p0 = por %p614_p13, %p613_p12 }
  0x1e   :  { %p616_p1 = pnand %p615_p0, %p609_p11 }
  0x20   :  { %619 = shalt.err (!%p616_p1)
}
  0x21   :  { %s650_s3 = smov 256   ;;  %s651_s25 = smov 16  }
  0x22   :  { %27 = dma.hbm_to_vmem [thread:$0]  %s773_s1, 4096, %s22_s16, [#allocation3], %s650_s3, %s650_s3, %s651_s25  }
  0x23   :  { %s652_s28 = smov [#allocation6]   ;;  %s620_s9 = scalar_lea.hbm %s777_s5, 2048 }
  0x24   :  { %s49_s29 = sshll.u32 %s652_s28, 4  ;;  %p621_p2 = scmp.ne.s32.totalorder %s777_s5, %s620_s9  ;;  %s50_s29 = int_to_ptr.vmem [resolvable:$true] %s49_s29 }
  0x25   :  { %p624_p3 = scmp.lt.u32.totalorder %s620_s9, %s777_s5 }
  0x27   :  { %p626_p4 = pnand %p624_p3, %p621_p2 }
  0x29   :  { %629 = shalt.err (!%p626_p4)
}
  0x2a   :  { %s630_s17 = scalar_lea.vmem %s50_s29, 2048  ;;  %p635_p6 = scmp.lt.s32.totalorder %s50_s29, %s50_s29 }
  0x2b   :  { %p631_p5 = scmp.ne.s32.totalorder %s50_s29, %s630_s17  ;;  %p636_p7 = scmp.lt.s32.totalorder %s630_s17, %s630_s17 }
  0x2d   :  { %p637_p8 = por %p636_p7, %p635_p6 }
  0x2f   :  { %p638_p9 = pnand %p637_p8, %p631_p5 }
  0x31   :  { %641 = shalt.err (!%p638_p9)
}
  0x32   :  { %55 = dma.hbm_to_vmem [thread:$0]  %s777_s5, 2048, %s50_s29, [#allocation5], %s647_s11, %s647_s11, %s648_s12  }
  0x33   :  { %642 = dma.done.wait [#allocation3], 4096  }
  0x34   :  { %643 = vsyncadd [#allocation3], 4294963200 }
  0x35   :  { %644 = dma.done.wait [#allocation5], 4096  }
  0x36   :  { %645 = vsyncadd [#allocation5], 4294963200  ;;  %v653_v0 = vmov 0.0   ;;  %v654_v1 = vmov 0.0|0.0   ;;  %v69_v2 = vld [vmem:[#allocation2 + $0x8] sm:$0xff]  ;;  %v71_v3 = vld [vmem:[#allocation2 + $0x18] sm:$0xff] }
  0x37   :  { %176 = vmatprep.mubr.f32.mxu0 %v653_v0  ;;  %518 = vmatprep.subr.bf16.mxu1 %v654_v1  ;;  %v68_v4 = vld [vmem:[#allocation2] sm:$0xff]  ;;  %v486_v5 = vpack.c.bf16 %v71_v3, %v69_v2  ;;  %v70_v6 = vld [vmem:[#allocation2 + $0x10] sm:$0xff]  ;;  %v73_v7 = vld [vmem:[#allocation2 + $0x28] sm:$0xff]  ;;  %vm655_vm0 = vmmov 0  }
  0x38   :  { %v75_v8 = vld [vmem:[#allocation2 + $0x38] sm:$0xff]  ;;  %v488_v9 = vpack.c.bf16 %v70_v6, %v68_v4  ;;  %v72_v11 = vld [vmem:[#allocation2 + $0x20] sm:$0xff]  ;;  %v74_v12 = vld [vmem:[#allocation2 + $0x30] sm:$0xff]  ;;  %448 = vmatprep.mubr.msk.f32.mxu1 %vm655_vm0, %v653_v0 }
  0x39   :  { %v490_v10 = vpack.c.bf16 %v75_v8, %v73_v7  ;;  %v77_v13 = vld [vmem:[#allocation2 + $0x48] sm:$0xff]  ;;  %487 = vmatprep.subr.bf16.mxu0 %v486_v5  ;;  %v79_v14 = vld [vmem:[#allocation2 + $0x58] sm:$0xff]  ;;  %v492_v15 = vpack.c.bf16 %v74_v12, %v72_v11  ;;  %v76_v17 = vld [vmem:[#allocation2 + $0x40] sm:$0xff] }
  0x3a   :  { %489 = vmatpush1.bf16.msra.mxu0 %v488_v9  ;;  %v494_v16 = vpack.c.bf16 %v79_v14, %v77_v13  ;;  %v78_v18 = vld [vmem:[#allocation2 + $0x50] sm:$0xff]  ;;  %v81_v19 = vld [vmem:[#allocation2 + $0x68] sm:$0xff]  ;;  %v83_v20 = vld [vmem:[#allocation2 + $0x78] sm:$0xff] }
  0x3b   :  { %491 = vmatprep.subr.bf16.mxu0 %v490_v10  ;;  %v496_v21 = vpack.c.bf16 %v78_v18, %v76_v17  ;;  %v498_v22 = vpack.c.bf16 %v83_v20, %v81_v19  ;;  %v80_v23 = vld [vmem:[#allocation2 + $0x60] sm:$0xff]  ;;  %v82_v24 = vld [vmem:[#allocation2 + $0x70] sm:$0xff]  ;;  %v85_v25 = vld [vmem:[#allocation2 + $0x88] sm:$0xff] }
  0x3c   :  { %v87_v26 = vld [vmem:[#allocation2 + $0x98] sm:$0xff]  ;;  %v184_v27 = vld [vmem:[#allocation4] sm:$0xff]  ;;  %v185_v28 = vld [vmem:[#allocation4 + $0x8] sm:$0xff]  ;;  %v500_v30 = vpack.c.bf16 %v82_v24, %v80_v23 }
  0x3d   :  { %v186_v29 = vld [vmem:[#allocation4 + $0x10] sm:$0xff]  ;;  %v519_v31 = vpack.c.bf16 %v185_v28, %v184_v27  ;;  %v187_v32 = vld [vmem:[#allocation4 + $0x18] sm:$0xff]  ;;  %v502_v33 = vpack.c.bf16 %v87_v26, %v85_v25  ;;  %v84_v34 = vld [vmem:[#allocation2 + $0x80] sm:$0xff] }
  0x3e   :  { %493 = vmatpush1.bf16.msra.mxu0 %v492_v15  ;;  %v86_v35 = vld [vmem:[#allocation2 + $0x90] sm:$0xff]  ;;  %v89_v36 = vld [vmem:[#allocation2 + $0xa8] sm:$0xff]  ;;  %v91_v37 = vld [vmem:[#allocation2 + $0xb8] sm:$0xff]  ;;  %v522_v38 = vpack.c.bf16 %v187_v32, %v186_v29 }
  0x3f   :  { %495 = vmatprep.subr.bf16.mxu0 %v494_v16  ;;  %520 = vmatpush3.bf16.msra.mxu1 %v519_v31  ;;  %v188_v39 = vld [vmem:[#allocation4 + $0x20] sm:$0xff]  ;;  %v189_v40 = vld [vmem:[#allocation4 + $0x28] sm:$0xff]  ;;  %v504_v41 = vpack.c.bf16 %v86_v35, %v84_v34  ;;  %v506_v42 = vpack.c.bf16 %v91_v37, %v89_v36  ;;  %v90_v44 = vld [vmem:[#allocation2 + $0xb0] sm:$0xff] }
  0x40   :  { %521 = vmatprep.subr.bf16.mxu1 %v654_v1  ;;  %v88_v43 = vld [vmem:[#allocation2 + $0xa0] sm:$0xff]  ;;  %v93_v45 = vld [vmem:[#allocation2 + $0xc8] sm:$0xff]  ;;  %v95_v46 = vld [vmem:[#allocation2 + $0xd8] sm:$0xff]  ;;  %v525_v47 = vpack.c.bf16 %v189_v40, %v188_v39 }
  0x41   :  { %v190_v48 = vld [vmem:[#allocation4 + $0x30] sm:$0xff]  ;;  %v191_v49 = vld [vmem:[#allocation4 + $0x38] sm:$0xff]  ;;  %v508_v50 = vpack.c.bf16 %v90_v44, %v88_v43  ;;  %v510_v51 = vpack.c.bf16 %v95_v46, %v93_v45  ;;  %v92_v52 = vld [vmem:[#allocation2 + $0xc0] sm:$0xff] }
  0x42   :  { %497 = vmatpush1.bf16.msra.mxu0 %v496_v21  ;;  %v94_v53 = vld [vmem:[#allocation2 + $0xd0] sm:$0xff]  ;;  %v97_v54 = vld [vmem:[#allocation2 + $0xe8] sm:$0xff]  ;;  %v99_v55 = vld [vmem:[#allocation2 + $0xf8] sm:$0xff]  ;;  %v528_v56 = vpack.c.bf16 %v191_v49, %v190_v48 }
  0x43   :  { %499 = vmatprep.subr.bf16.mxu0 %v498_v22  ;;  %523 = vmatpush3.bf16.msra.mxu1 %v522_v38  ;;  %v192_v57 = vld [vmem:[#allocation4 + $0x40] sm:$0xff]  ;;  %v193_v58 = vld [vmem:[#allocation4 + $0x48] sm:$0xff]  ;;  %v512_v59 = vpack.c.bf16 %v94_v53, %v92_v52  ;;  %v514_v60 = vpack.c.bf16 %v99_v55, %v97_v54  ;;  %v98_v62 = vld [vmem:[#allocation2 + $0xf0] sm:$0xff] }
  0x44   :  { %524 = vmatprep.subr.bf16.mxu1 %v654_v1  ;;  %v96_v61 = vld [vmem:[#allocation2 + $0xe0] sm:$0xff]  ;;  %v531_v63 = vpack.c.bf16 %v193_v58, %v192_v57  ;;  %v194_v2 = vld [vmem:[#allocation4 + $0x50] sm:$0xff]  ;;  %v195_v3 = vld [vmem:[#allocation4 + $0x58] sm:$0xff] }
  0x45   :  { %v516_v4 = vpack.c.bf16 %v98_v62, %v96_v61  ;;  %v534_v5 = vpack.c.bf16 %v195_v3, %v194_v2  ;;  %v196_v6 = vld [vmem:[#allocation4 + $0x60] sm:$0xff]  ;;  %v197_v7 = vld [vmem:[#allocation4 + $0x68] sm:$0xff]  ;;  %v198_v10 = vld [vmem:[#allocation4 + $0x70] sm:$0xff] }
  0x46   :  { %501 = vmatpush1.bf16.msra.mxu0 %v500_v30  ;;  %v67_v8 = vld [vmem:[%s772_s0] sm:$0xff]  ;;  %v537_v9 = vpack.c.bf16 %v197_v7, %v196_v6  ;;  %v199_v11 = vld [vmem:[#allocation4 + $0x78] sm:$0xff]  ;;  %v279_v14 = vld [vmem:[#allocation6 + $0x8] sm:$0xff] }
  0x47   :  { %503 = vmatprep.subr.bf16.mxu0 %v502_v33  ;;  %526 = vmatpush3.bf16.msra.mxu1 %v525_v47  ;;  %v540_v12 = vpack.c.bf16 %v199_v11, %v198_v10  ;;  %v278_v13 = vld [vmem:[#allocation6] sm:$0xff]  ;;  %v280_v15 = vld [vmem:[#allocation6 + $0x10] sm:$0xff]  ;;  %v281_v17 = vld [vmem:[#allocation6 + $0x18] sm:$0xff]  ;;  %v102_v33 = vlaneseq }
  0x48   :  { %527 = vmatprep.subr.bf16.mxu1 %v654_v1  ;;  %v543_v16 = vpack.c.bf16 %v279_v14, %v278_v13  ;;  %v546_v18 = vpack.c.bf16 %v281_v17, %v280_v15  ;;  %v282_v19 = vld [vmem:[#allocation6 + $0x20] sm:$0xff]  ;;  %v283_v20 = vld [vmem:[#allocation6 + $0x28] sm:$0xff]  ;;  %v284_v22 = vld [vmem:[#allocation6 + $0x30] sm:$0xff] }
  0x49   :  { %v549_v21 = vpack.c.bf16 %v283_v20, %v282_v19  ;;  %v285_v23 = vld [vmem:[#allocation6 + $0x38] sm:$0xff]  ;;  %v287_v25 = vld [vmem:[#allocation6 + $0x48] sm:$0xff]  ;;  %v288_v27 = vld [vmem:[#allocation6 + $0x50] sm:$0xff]  ;;  %v103_v34 = vshrl.u32 %v102_v33, 7 }
  0x4a   :  { %505 = vmatpush1.bf16.msra.mxu0 %v504_v41  ;;  %v552_v24 = vpack.c.bf16 %v285_v23, %v284_v22  ;;  %v289_v28 = vld [vmem:[#allocation6 + $0x58] sm:$0xff]  ;;  %v290_v30 = vld [vmem:[#allocation6 + $0x60] sm:$0xff]  ;;  %v291_v31 = vld [vmem:[#allocation6 + $0x68] sm:$0xff] }
  0x4b   :  { %507 = vmatprep.subr.bf16.mxu0 %v506_v42  ;;  %529 = vmatpush3.bf16.msra.mxu1 %v528_v56  ;;  %v558_v29 = vpack.c.bf16 %v289_v28, %v288_v27  ;;  %v561_v32 = vpack.c.bf16 %v291_v31, %v290_v30  ;;  %v104_v35 = vsub.s32 0, %v103_v34  ;;  %v100_v36 = vld [vmem:[%s774_s2] sm:$0x3]  ;;  %v292_v42 = vld [vmem:[#allocation6 + $0x70] sm:$0xff]  ;;  %v293_v43 = vld [vmem:[#allocation6 + $0x78] sm:$0xff]  ;;  %v108_v49 = vsub.s32 1, %v103_v34 }
  0x4c   :  { %530 = vmatprep.subr.bf16.mxu1 %v654_v1  ;;  %v564_v44 = vpack.c.bf16 %v293_v43, %v292_v42 }
  0x4d   :  { %v105_v37 = vrot.slane %v100_v36, %v104_v35 }
  0x4e   :  { %509 = vmatpush1.bf16.msra.mxu0 %v508_v50  ;;  %v381_v50 = vld [vmem:[%s778_s6] ss:$0 sm:$0xff] }
  0x4f   :  { %511 = vmatprep.subr.bf16.mxu0 %v510_v51  ;;  %532 = vmatpush3.bf16.msra.mxu1 %v531_v63  ;;  %v109_v51 = vrot.slane %v100_v36, %v108_v49 }
  0x50   :  { %533 = vmatprep.subr.bf16.mxu1 %v654_v1 }
  0x52   :  { %513 = vmatpush1.bf16.msra.mxu0 %v512_v59 }
  0x53   :  { %515 = vmatprep.subr.bf16.mxu0 %v514_v60  ;;  %535 = vmatpush3.bf16.msra.mxu1 %v534_v5 }
  0x54   :  { %536 = vmatprep.subr.bf16.mxu1 %v654_v1 }
  0x56   :  { %517 = vmatpush1.bf16.msra.mxu0 %v516_v4 }
  0x57   :  { %542 = vmatprep.subr.bf16.mxu0 %v654_v1  ;;  %538 = vmatpush3.bf16.msra.mxu1 %v537_v9 }
  0x58   :  { %539 = vmatprep.subr.bf16.mxu1 %v654_v1 }
  0x59   :  { %177 = vmatmul.mubr.f32.vlgmr.msra.gmra.mrb[0].mxu0 %v67_v8 }
  0x5a   :  { %483 = vmatprep.mubr.msk.f32.mxu0 %vm655_vm0, %v653_v0  ;;  %544 = vmatpush3.bf16.msra.mxu0 %v543_v16  ;;  %v286_v0 = vld [vmem:[#allocation6 + $0x40] sm:$0xff] }
  0x5b   :  { %541 = vmatpush3.bf16.msra.mxu1 %v540_v12  ;;  %545 = vmatprep.subr.bf16.mxu0 %v654_v1  ;;  %v555_v26 = vpack.c.bf16 %v287_v25, %v286_v0 }
  0x5e   :  { %547 = vmatpush3.bf16.msra.mxu0 %v546_v18 }
  0x5f   :  { %548 = vmatprep.subr.bf16.mxu0 %v654_v1 }
  0x62   :  { %550 = vmatpush3.bf16.msra.mxu0 %v549_v21 }
  0x63   :  { %551 = vmatprep.subr.bf16.mxu0 %v654_v1 }
  0x66   :  { %553 = vmatpush3.bf16.msra.mxu0 %v552_v24 }
  0x67   :  { %554 = vmatprep.subr.bf16.mxu0 %v654_v1 }
  0x6a   :  { %556 = vmatpush3.bf16.msra.mxu0 %v555_v26 }
  0x6b   :  { %557 = vmatprep.subr.bf16.mxu0 %v654_v1 }
  0x6e   :  { %559 = vmatpush3.bf16.msra.mxu0 %v558_v29 }
  0x6f   :  { %560 = vmatprep.subr.bf16.mxu0 %v654_v1 }
  0x72   :  { %562 = vmatpush3.bf16.msra.mxu0 %v561_v32 }
  0x73   :  { %563 = vmatprep.subr.bf16.mxu0 %v654_v1  ;;  %v380_v1 = vld [vmem:[%s776_s4] ss:$0 sm:$0xff] }
  0x76   :  { %565 = vmatpush3.bf16.msra.mxu0 %v564_v44 }
 0x12c   :  { %v178_v38 = vpop.f32.mrb[0].mxu0 }
 0x12d   :  { %v179_v39 = vadd.f32 %v178_v38, %v105_v37  ;;  %v180_v40 = vpop.f32.mrb[1].mxu0 }
 0x12e   :  { %v181_v55 = vadd.f32 %v180_v40, %v109_v51 }
 0x12f   :  { %v183_v41 = vmax.f32 %v179_v39, 0.0 }
 0x131   :  { %449 = vmatmul.mubr.f32.vlgmr.msra.gmra.mrb[0].mxu1 %v183_v41 }
 0x204   :  { %v273_v45 = vpop.f32.mrb[0].mxu1 }
 0x205   :  { %v274_v46 = vadd.f32 %v380_v1, %v273_v45  ;;  %v450_v47 = vpop.f32.mrb[1].mxu1 }
 0x207   :  { %v277_v48 = vmax.f32 %v274_v46, 0.0 }
 0x209   :  { %484 = vmatmul.mubr.f32.vlgmr.msra.gmra.mrb[2].mxu0 %v277_v48 }
 0x2dc   :  { %v367_v52 = vpop.f32.mrb[2].mxu0 }
 0x2dd   :  { %v368_v53 = vadd.f32 %v381_v50, %v367_v52  ;;  %v485_v54 = vpop.f32.mrb[3].mxu0 }
 0x2df   :  { %v371_v56 = vmax.f32 %v368_v53, 0.0 }
 0x2e1   :  { %v372_v57 = vadd.f32 %v371_v56, %v181_v55 }
 0x2e3   :  { %373 = vst [vmem:[%s779_s7] sm:$0xff] %v372_v57 }
 0x2e4   :  { %378 = vsyncpa [#allocation3], 1 }
 0x2e5   :  { %379 = vsyncpa [#allocation5], 1 }

</bundles_post_ra>
